<compile_context>
chip_gen: v6e
topology: v6e:2x2x1
jax: 0.10.0
libtpu: 0.0.40
codegen_flags: <defaults>
</compile_context>

<pallas_src>
import functools
import numpy as np
import jax
import jax.numpy as jnp
from jax.experimental import pallas as pl
from jax.experimental.pallas import tpu as pltpu


# -----------------------------------------------------------------------------
# Kernel 1: pairwise IoU between proposals and gt boxes + max / argmax over gt
# -----------------------------------------------------------------------------
def _iou_kernel(rois_ref, gt_ref, maxov_ref, assign_ref):
    B = rois_ref.shape[0]
    G = gt_ref.shape[1]

    for b in range(B):                      # B is static & small; unrolled at trace time
        rois = rois_ref[b]                  # (4, N)  rows = x1, y1, x2, y2 ; N on lanes
        gt = gt_ref[b]                      # (G, 4)  G on sublanes

        rx1 = rois[0:1, :]
        ry1 = rois[1:2, :]
        rx2 = rois[2:3, :]
        ry2 = rois[3:4, :]                  # (1, N)

        gx1 = gt[:, 0:1]
        gy1 = gt[:, 1:2]
        gx2 = gt[:, 2:3]
        gy2 = gt[:, 3:4]                    # (G, 1)

        rw = rx2 - rx1 + 1.0
        rh = ry2 - ry1 + 1.0                # (1, N)
        gw = gx2 - gx1 + 1.0
        gh = gy2 - gy1 + 1.0                # (G, 1)

        r_area = rw * rh                    # (1, N)
        g_area = gw * gh                    # (G, 1)

        iw = jnp.minimum(rx2, gx2) - jnp.maximum(rx1, gx1) + 1.0    # (G, N)
        iw = jnp.maximum(iw, 0.0)
        ih = jnp.minimum(ry2, gy2) - jnp.maximum(ry1, gy1) + 1.0
        ih = jnp.maximum(ih, 0.0)
        inter = iw * ih
        ua = r_area + g_area - inter
        # divide -> EUP slot (otherwise idle); IoU only feeds threshold comparisons
        ov = inter * pl.reciprocal(ua, approx=True)                 # (G, N)

        # zero-area gt -> overlap 0 ; zero-area proposal -> overlap -1 (same order as reference)
        gt_zero = jnp.logical_and(gw == 1.0, gh == 1.0)             # (G, 1)
        r_zero = jnp.logical_and(rw == 1.0, rh == 1.0)              # (1, N)
        ov = jnp.where(gt_zero, 0.0, ov)
        ov = jnp.where(r_zero, -1.0, ov)

        # max / argmax over gt = sublane reduce (XLU); min-index tie-break (deterministic)
        mx = jnp.max(ov, axis=0, keepdims=True)                     # (1, N)
        idx = jax.lax.broadcasted_iota(jnp.int32, ov.shape, 0)      # (G, N)
        am = jnp.min(jnp.where(ov == mx, idx, jnp.int32(G)),
                     axis=0, keepdims=True)                         # (1, N)

        maxov_ref[b] = mx                                           # lane-dense store
        assign_ref[b] = am


def compute_max_overlaps(rois_t, gt_boxes4):
    """rois_t: (B, 4, N) f32 ; gt_boxes4: (B, G, 4) f32 ->
       max_overlaps (B, N) f32, gt_assignment (B, N) i32"""
    B, _, N = rois_t.shape
    maxov, assign = pl.pallas_call(
        _iou_kernel,
        out_shape=(jax.ShapeDtypeStruct((B, 1, N), jnp.float32),
                   jax.ShapeDtypeStruct((B, 1, N), jnp.int32)),
        in_specs=[pl.BlockSpec(memory_space=pltpu.MemorySpace.VMEM),
                  pl.BlockSpec(memory_space=pltpu.MemorySpace.VMEM)],
        out_specs=(pl.BlockSpec(memory_space=pltpu.MemorySpace.VMEM),
                   pl.BlockSpec(memory_space=pltpu.MemorySpace.VMEM)),
    )(rois_t, gt_boxes4)
    return maxov[:, 0, :], assign[:, 0, :]


# -----------------------------------------------------------------------------
# Kernel 2: bbox encode (dx, dy, dw, dh) + normalization + zero where label == 0
# -----------------------------------------------------------------------------
def _targets_kernel(means, stds, ex_ref, gt_ref, lbl_ref, out_ref):
    # means/stds are Python floats -> inline scalar literals (no captured array constants)
    m0, m1, m2, m3 = means
    is0, is1, is2, is3 = (1.0 / s for s in stds)
    B = ex_ref.shape[0]

    for b in range(B):
        ex = ex_ref[b]              # (4, R)  coords-first, R on lanes
        gt = gt_ref[b]              # (4, R)
        keep = lbl_ref[b] > 0.0     # (1, R)

        ex_w = ex[2:3, :] - ex[0:1, :] + 1.0
        ex_h = ex[3:4, :] - ex[1:2, :] + 1.0
        ex_cx = ex[0:1, :] + 0.5 * ex_w
        ex_cy = ex[1:2, :] + 0.5 * ex_h

        gt_w = gt[2:3, :] - gt[0:1, :] + 1.0
        gt_h = gt[3:4, :] - gt[1:2, :] + 1.0
        gt_cx = gt[0:1, :] + 0.5 * gt_w
        gt_cy = gt[1:2, :] + 0.5 * gt_h

        dx = (gt_cx - ex_cx) / ex_w
        dy = (gt_cy - ex_cy) / ex_h
        dw = jnp.log(gt_w / ex_w)
        dh = jnp.log(gt_h / ex_h)

        # write the 4 target rows directly (no concatenate), fused normalize + label mask
        out_ref[b, 0:1, :] = jnp.where(keep, (dx - m0) * is0, 0.0)
        out_ref[b, 1:2, :] = jnp.where(keep, (dy - m1) * is1, 0.0)
        out_ref[b, 2:3, :] = jnp.where(keep, (dw - m2) * is2, 0.0)
        out_ref[b, 3:4, :] = jnp.where(keep, (dh - m3) * is3, 0.0)


def compute_bbox_targets(ex_rois_t, gt_rois_t, labels, means, stds):
    """ex_rois_t, gt_rois_t: (B, 4, R) f32 ; labels: (B, R) f32 -> (B, R, 4) f32"""
    B, _, R = ex_rois_t.shape
    lbl = labels[:, None, :]                        # (B, 1, R)
    kernel = functools.partial(
        _targets_kernel,
        tuple(float(m) for m in means),
        tuple(float(s) for s in stds))
    out = pl.pallas_call(
        kernel,
        out_shape=jax.ShapeDtypeStruct((B, 4, R), jnp.float32),
        in_specs=[pl.BlockSpec(memory_space=pltpu.MemorySpace.VMEM),
                  pl.BlockSpec(memory_space=pltpu.MemorySpace.VMEM),
                  pl.BlockSpec(memory_space=pltpu.MemorySpace.VMEM)],
        out_specs=pl.BlockSpec(memory_space=pltpu.MemorySpace.VMEM),
    )(ex_rois_t, gt_rois_t, lbl)
    return jnp.transpose(out, (0, 2, 1))            # back to (B, R, 4)


# -----------------------------------------------------------------------------
# JAX glue: fg/bg sampling (deterministic stand-in for the np.random sampling)
# -----------------------------------------------------------------------------
def _sample_rois(all_rois, gt_boxes, max_overlaps, gt_assignment,
                 num_fg_per_image, num_rois_per_image,
                 fg_thresh, bg_hi, bg_lo):
    def per_image(img_idx, rois_i, gt_i, maxov_i, assign_i):
        labels_all = gt_i[:, 4][assign_i]                       # (N,)
        fg_mask = maxov_i >= fg_thresh
        bg_mask = jnp.logical_and(maxov_i < bg_hi, maxov_i >= bg_lo)
        num_fg = jnp.sum(fg_mask.astype(jnp.int32))
        num_bg = jnp.sum(bg_mask.astype(jnp.int32))

        # deterministic ordering: matching indices first (ascending), stable
        fg_order = jnp.argsort(jnp.where(fg_mask, 0, 1))
        bg_order = jnp.argsort(jnp.where(bg_mask, 0, 1))

        num_fg_this = jnp.where(
            jnp.logical_and(num_fg > 0, num_bg > 0),
            jnp.minimum(num_fg_per_image, num_fg),
            jnp.where(num_fg > 0, num_rois_per_image, 0),
        )

        slot = jnp.arange(num_rois_per_image)
        fg_pick = fg_order[slot % jnp.maximum(num_fg, 1)]
        bg_pick = bg_order[(slot - num_fg_this) % jnp.maximum(num_bg, 1)]
        keep = jnp.where(slot < num_fg_this, fg_pick, bg_pick)

        labels_b = jnp.where(slot < num_fg_this, labels_all[keep], 0.0)
        rois_b = rois_i[keep]                                   # (R, 5)
        rois_b = rois_b.at[:, 0].set(img_idx.astype(rois_i.dtype))
        gt_rois_b = gt_i[assign_i[keep]]                        # (R, 5)
        return rois_b, labels_b, gt_rois_b

    B = all_rois.shape[0]
    return jax.vmap(per_image)(jnp.arange(B), all_rois, gt_boxes,
                               max_overlaps, gt_assignment)


# -----------------------------------------------------------------------------
# Module wrapper
# -----------------------------------------------------------------------------
class BuildProposalTargetLayerPallas:
    def __init__(self, mode, cfg):
        self.mode = mode
        self.cfg = cfg
        if mode == 'TRAIN':
            self.bbox_normalize_means = tuple(cfg.TRAIN_BBOX_NORMALIZE_MEANS)
            self.bbox_normalize_stds = tuple(cfg.TRAIN_BBOX_NORMALIZE_STDS)
            self.roi_batchsize = cfg.TRAIN_ROI_BATCHSIZE
            self.roi_fg_fraction = cfg.TRAIN_ROI_FG_FRACTION
            self.roi_fg_thresh = cfg.TRAIN_ROI_FG_THRESH
            self.roi_bg_thresh_hi = cfg.TRAIN_ROI_BG_THRESH_HI
            self.roi_bg_thresh_lo = cfg.TRAIN_ROI_BG_THRESH_LO
        elif mode == 'TEST':
            self.bbox_normalize_means = tuple(cfg.TEST_BBOX_NORMALIZE_MEANS)
            self.bbox_normalize_stds = tuple(cfg.TEST_BBOX_NORMALIZE_STDS)
            self.roi_batchsize = cfg.TEST_ROI_BATCHSIZE
            self.roi_fg_fraction = cfg.TEST_ROI_FG_FRACTION
            self.roi_fg_thresh = cfg.TEST_ROI_FG_THRESH
            self.roi_bg_thresh_hi = cfg.TEST_ROI_BG_THRESH_HI
            self.roi_bg_thresh_lo = cfg.TEST_ROI_BG_THRESH_LO
        else:
            raise ValueError('Unkown mode <%s> in buildProposalTargetLayer...' % mode)

    def __call__(self, all_rois, gt_boxes, num_gt_boxes):
        del num_gt_boxes  # unused in the forward pass (same as reference)
        all_rois = all_rois.astype(jnp.float32)
        gt_boxes = gt_boxes.astype(jnp.float32)

        # append gt boxes to the proposal list (col 0 = 0, cols 1:5 = gt coords)
        B, G, _ = gt_boxes.shape
        gt_append = jnp.zeros((B, G, 5), jnp.float32)
        gt_append = gt_append.at[..., 1:5].set(gt_boxes[..., :4])
        all_rois = jnp.concatenate([all_rois, gt_append], axis=1)   # (B, N, 5)

        num_rois_per_image = self.roi_batchsize
        num_rois_fg_per_image = int(np.round(self.roi_fg_fraction * num_rois_per_image))

        # --- Pallas kernel 1: pairwise IoU + max / argmax over gt boxes ---
        # proposals coords-first (N on lanes); gt stays (B, G, 4)
        rois_t = jnp.transpose(all_rois[..., 1:5], (0, 2, 1))       # (B, 4, N)
        gt4 = gt_boxes[..., :4]                                     # (B, G, 4)
        max_overlaps, gt_assignment = compute_max_overlaps(rois_t, gt4)

        # --- JAX glue: fg/bg sampling ---
        rois_batch, labels_batch, gt_rois_batch = _sample_rois(
            all_rois, gt_boxes, max_overlaps, gt_assignment,
            num_rois_fg_per_image, num_rois_per_image,
            self.roi_fg_thresh, self.roi_bg_thresh_hi, self.roi_bg_thresh_lo)

        # --- Pallas kernel 2: bbox encode + normalize + zero non-fg rows ---
        ex_t = jnp.transpose(rois_batch[..., 1:5], (0, 2, 1))       # (B, 4, R)
        gtr_t = jnp.transpose(gt_rois_batch[..., :4], (0, 2, 1))    # (B, 4, R)
        bbox_targets = compute_bbox_targets(
            ex_t, gtr_t, labels_batch,
            self.bbox_normalize_means, self.bbox_normalize_stds)

        return rois_batch, labels_batch, bbox_targets


# -----------------------------------------------------------------------------
# Example / smoke test
# -----------------------------------------------------------------------------
class _Cfg:
    TRAIN_BBOX_NORMALIZE_MEANS = (0.0, 0.0, 0.0, 0.0)
    TRAIN_BBOX_NORMALIZE_STDS = (0.1, 0.1, 0.2, 0.2)
    TRAIN_ROI_BATCHSIZE = 32
    TRAIN_ROI_FG_FRACTION = 0.25
    TRAIN_ROI_FG_THRESH = 0.5
    TRAIN_ROI_BG_THRESH_HI = 0.5
    TRAIN_ROI_BG_THRESH_LO = 0.0


if __name__ == "__main__":
    key = jax.random.PRNGKey(0)
    B, R, G = 2, 64, 8

    k1, k2, k3, k4, k5 = jax.random.split(key, 5)
    # proposals: (B, R, 5) with col 0 = batch index, cols 1:5 = x1, y1, x2, y2
    xy1 = jax.random.uniform(k1, (B, R, 2), minval=0.0, maxval=150.0)
    wh = jax.random.uniform(k2, (B, R, 2), minval=8.0, maxval=80.0)
    boxes = jnp.concatenate([xy1, xy1 + wh], axis=-1)
    batch_col = jnp.broadcast_to(
        jnp.arange(B, dtype=jnp.float32)[:, None, None], (B, R, 1))
    all_rois = jnp.concatenate([batch_col, boxes], axis=-1)

    # gt boxes: (B, G, 5) with cols 0:4 = coords, col 4 = class label; last 2 rows zero-padded
    gxy1 = jax.random.uniform(k3, (B, G, 2), minval=0.0, maxval=150.0)
    gwh = jax.random.uniform(k4, (B, G, 2), minval=16.0, maxval=80.0)
    glabels = jax.random.randint(k5, (B, G, 1), 1, 5).astype(jnp.float32)
    gt_boxes = jnp.concatenate([gxy1, gxy1 + gwh, glabels], axis=-1)
    gt_boxes = gt_boxes.at[:, G - 2:, :].set(0.0)
    num_gt_boxes = jnp.array([G - 2, G - 2], dtype=jnp.int32)

    layer = BuildProposalTargetLayerPallas('TRAIN', _Cfg())
    rois_out, labels_out, bbox_targets_out = layer(all_rois, gt_boxes, num_gt_boxes)
    jax.block_until_ready((rois_out, labels_out, bbox_targets_out))

    assert rois_out.shape == (B, _Cfg.TRAIN_ROI_BATCHSIZE, 5)
    assert labels_out.shape == (B, _Cfg.TRAIN_ROI_BATCHSIZE)
    assert bbox_targets_out.shape == (B, _Cfg.TRAIN_ROI_BATCHSIZE, 4)
    assert bool(jnp.all(jnp.isfinite(bbox_targets_out)))
    print("KERNEL_OK")
</pallas_src>

<mosaic_0001>
module attributes {stable_mosaic.version = 11 : i64} {
  func.func @_iou_kernel(%arg0: memref<2x4x72xf32, #tpu.memory_space<vmem>>, %arg1: memref<2x8x4xf32, #tpu.memory_space<vmem>>, %arg2: memref<2x1x72xf32, #tpu.memory_space<vmem>>, %arg3: memref<2x1x72xi32, #tpu.memory_space<vmem>>) attributes {dimension_semantics = [], scalar_prefetch = 0 : i64, scratch_operands = 0 : i64, tpu.core_type = #tpu.core_type<tc>} {
    %c0 = arith.constant 0 : index
    %c0_0 = arith.constant 0 : index
    %c0_1 = arith.constant 0 : index
    %0 = vector.load %arg0[%c0, %c0_0, %c0_1] : memref<2x4x72xf32, #tpu.memory_space<vmem>>, vector<1x4x72xf32>
    %1 = vector.shape_cast %0 : vector<1x4x72xf32> to vector<4x72xf32>
    %c0_2 = arith.constant 0 : index
    %c0_3 = arith.constant 0 : index
    %c0_4 = arith.constant 0 : index
    %2 = vector.load %arg1[%c0_2, %c0_3, %c0_4] : memref<2x8x4xf32, #tpu.memory_space<vmem>>, vector<1x8x4xf32>
    %3 = vector.shape_cast %2 : vector<1x8x4xf32> to vector<8x4xf32>
    %4 = vector.extract_strided_slice %1 {offsets = [0, 0], sizes = [1, 72], strides = [1, 1]} : vector<4x72xf32> to vector<1x72xf32>
    %5 = vector.extract_strided_slice %1 {offsets = [1, 0], sizes = [1, 72], strides = [1, 1]} : vector<4x72xf32> to vector<1x72xf32>
    %6 = vector.extract_strided_slice %1 {offsets = [2, 0], sizes = [1, 72], strides = [1, 1]} : vector<4x72xf32> to vector<1x72xf32>
    %7 = vector.extract_strided_slice %1 {offsets = [3, 0], sizes = [1, 72], strides = [1, 1]} : vector<4x72xf32> to vector<1x72xf32>
    %8 = vector.extract_strided_slice %3 {offsets = [0, 0], sizes = [8, 1], strides = [1, 1]} : vector<8x4xf32> to vector<8x1xf32>
    %9 = vector.extract_strided_slice %3 {offsets = [0, 1], sizes = [8, 1], strides = [1, 1]} : vector<8x4xf32> to vector<8x1xf32>
    %10 = vector.extract_strided_slice %3 {offsets = [0, 2], sizes = [8, 1], strides = [1, 1]} : vector<8x4xf32> to vector<8x1xf32>
    %11 = vector.extract_strided_slice %3 {offsets = [0, 3], sizes = [8, 1], strides = [1, 1]} : vector<8x4xf32> to vector<8x1xf32>
    %12 = arith.subf %6, %4 : vector<1x72xf32>
    %cst = arith.constant 1.000000e+00 : f32
    %13 = vector.broadcast %cst : f32 to vector<1x72xf32>
    %14 = arith.addf %12, %13 : vector<1x72xf32>
    %15 = arith.subf %7, %5 : vector<1x72xf32>
    %cst_5 = arith.constant 1.000000e+00 : f32
    %16 = vector.broadcast %cst_5 : f32 to vector<1x72xf32>
    %17 = arith.addf %15, %16 : vector<1x72xf32>
    %18 = arith.subf %10, %8 : vector<8x1xf32>
    %cst_6 = arith.constant 1.000000e+00 : f32
    %19 = vector.broadcast %cst_6 : f32 to vector<8x1xf32>
    %20 = arith.addf %18, %19 : vector<8x1xf32>
    %21 = arith.subf %11, %9 : vector<8x1xf32>
    %cst_7 = arith.constant 1.000000e+00 : f32
    %22 = vector.broadcast %cst_7 : f32 to vector<8x1xf32>
    %23 = arith.addf %21, %22 : vector<8x1xf32>
    %24 = arith.mulf %14, %17 : vector<1x72xf32>
    %25 = arith.mulf %20, %23 : vector<8x1xf32>
    %26 = vector.broadcast %6 : vector<1x72xf32> to vector<8x72xf32>
    %27 = vector.broadcast %10 : vector<8x1xf32> to vector<8x72xf32>
    %28 = arith.minimumf %26, %27 : vector<8x72xf32>
    %29 = vector.broadcast %4 : vector<1x72xf32> to vector<8x72xf32>
    %30 = vector.broadcast %8 : vector<8x1xf32> to vector<8x72xf32>
    %31 = arith.maximumf %29, %30 : vector<8x72xf32>
    %32 = arith.subf %28, %31 : vector<8x72xf32>
    %cst_8 = arith.constant 1.000000e+00 : f32
    %33 = vector.broadcast %cst_8 : f32 to vector<8x72xf32>
    %34 = arith.addf %32, %33 : vector<8x72xf32>
    %cst_9 = arith.constant 0.000000e+00 : f32
    %35 = vector.broadcast %cst_9 : f32 to vector<8x72xf32>
    %36 = arith.maximumf %34, %35 : vector<8x72xf32>
    %37 = vector.broadcast %7 : vector<1x72xf32> to vector<8x72xf32>
    %38 = vector.broadcast %11 : vector<8x1xf32> to vector<8x72xf32>
    %39 = arith.minimumf %37, %38 : vector<8x72xf32>
    %40 = vector.broadcast %5 : vector<1x72xf32> to vector<8x72xf32>
    %41 = vector.broadcast %9 : vector<8x1xf32> to vector<8x72xf32>
    %42 = arith.maximumf %40, %41 : vector<8x72xf32>
    %43 = arith.subf %39, %42 : vector<8x72xf32>
    %cst_10 = arith.constant 1.000000e+00 : f32
    %44 = vector.broadcast %cst_10 : f32 to vector<8x72xf32>
    %45 = arith.addf %43, %44 : vector<8x72xf32>
    %cst_11 = arith.constant 0.000000e+00 : f32
    %46 = vector.broadcast %cst_11 : f32 to vector<8x72xf32>
    %47 = arith.maximumf %45, %46 : vector<8x72xf32>
    %48 = arith.mulf %36, %47 : vector<8x72xf32>
    %49 = vector.broadcast %24 : vector<1x72xf32> to vector<8x72xf32>
    %50 = vector.broadcast %25 : vector<8x1xf32> to vector<8x72xf32>
    %51 = arith.addf %49, %50 : vector<8x72xf32>
    %52 = arith.subf %51, %48 : vector<8x72xf32>
    %53 = tpu.reciprocal %52 {approx = true} : vector<8x72xf32> -> vector<8x72xf32>
    %54 = arith.mulf %48, %53 : vector<8x72xf32>
    %cst_12 = arith.constant 1.000000e+00 : f32
    %55 = vector.broadcast %cst_12 : f32 to vector<8x1xf32>
    %56 = arith.cmpf oeq, %20, %55 : vector<8x1xf32>
    %cst_13 = arith.constant 1.000000e+00 : f32
    %57 = vector.broadcast %cst_13 : f32 to vector<8x1xf32>
    %58 = arith.cmpf oeq, %23, %57 : vector<8x1xf32>
    %59 = arith.andi %56, %58 : vector<8x1xi1>
    %cst_14 = arith.constant 1.000000e+00 : f32
    %60 = vector.broadcast %cst_14 : f32 to vector<1x72xf32>
    %61 = arith.cmpf oeq, %14, %60 : vector<1x72xf32>
    %cst_15 = arith.constant 1.000000e+00 : f32
    %62 = vector.broadcast %cst_15 : f32 to vector<1x72xf32>
    %63 = arith.cmpf oeq, %17, %62 : vector<1x72xf32>
    %64 = arith.andi %61, %63 : vector<1x72xi1>
    %cst_16 = arith.constant 0.000000e+00 : f32
    %65 = vector.shape_cast %59 : vector<8x1xi1> to vector<8x1xi1>
    %66 = vector.broadcast %65 : vector<8x1xi1> to vector<8x72xi1>
    %67 = vector.broadcast %cst_16 : f32 to vector<8x72xf32>
    %68 = arith.select %66, %67, %54 : vector<8x72xi1>, vector<8x72xf32>
    %cst_17 = arith.constant -1.000000e+00 : f32
    %69 = vector.shape_cast %64 : vector<1x72xi1> to vector<1x72xi1>
    %70 = vector.broadcast %69 : vector<1x72xi1> to vector<8x72xi1>
    %71 = vector.broadcast %cst_17 : f32 to vector<8x72xf32>
    %72 = arith.select %70, %71, %68 : vector<8x72xi1>, vector<8x72xf32>
    %cst_18 = arith.constant dense<0xFF800000> : vector<72xf32>
    %73 = vector.multi_reduction <maximumf>, %72, %cst_18 [0] : vector<8x72xf32> to vector<72xf32>
    %74 = vector.shape_cast %73 : vector<72xf32> to vector<1x72xf32>
    %75 = tpu.iota {dimensions = array<i32: 0>} : vector<8x72xi32>
    %76 = vector.broadcast %74 : vector<1x72xf32> to vector<8x72xf32>
    %77 = arith.cmpf oeq, %72, %76 : vector<8x72xf32>
    %c8_i32 = arith.constant 8 : i32
    %78 = vector.broadcast %c8_i32 : i32 to vector<8x72xi32>
    %79 = arith.select %77, %75, %78 : vector<8x72xi1>, vector<8x72xi32>
    %cst_19 = arith.constant dense<2147483647> : vector<72xi32>
    %80 = vector.multi_reduction <minsi>, %79, %cst_19 [0] : vector<8x72xi32> to vector<72xi32>
    %81 = vector.shape_cast %80 : vector<72xi32> to vector<1x72xi32>
    %c0_20 = arith.constant 0 : index
    %c0_21 = arith.constant 0 : index
    %c0_22 = arith.constant 0 : index
    %82 = vector.load %arg2[%c0_20, %c0_21, %c0_22] : memref<2x1x72xf32, #tpu.memory_space<vmem>>, vector<1x1x72xf32>
    %83 = vector.shape_cast %82 : vector<1x1x72xf32> to vector<1x72xf32>
    %84 = vector.shape_cast %74 : vector<1x72xf32> to vector<1x1x72xf32>
    tpu.vector_store %arg2[%c0_20, %c0_21, %c0_22], %84 {strides = array<i32>} : memref<2x1x72xf32, #tpu.memory_space<vmem>>, vector<1x1x72xf32>,
    %c0_23 = arith.constant 0 : index
    %c0_24 = arith.constant 0 : index
    %c0_25 = arith.constant 0 : index
    %85 = vector.load %arg3[%c0_23, %c0_24, %c0_25] : memref<2x1x72xi32, #tpu.memory_space<vmem>>, vector<1x1x72xi32>
    %86 = vector.shape_cast %85 : vector<1x1x72xi32> to vector<1x72xi32>
    %87 = vector.shape_cast %81 : vector<1x72xi32> to vector<1x1x72xi32>
    tpu.vector_store %arg3[%c0_23, %c0_24, %c0_25], %87 {strides = array<i32>} : memref<2x1x72xi32, #tpu.memory_space<vmem>>, vector<1x1x72xi32>,
    %c1 = arith.constant 1 : index
    %c0_26 = arith.constant 0 : index
    %c0_27 = arith.constant 0 : index
    %88 = vector.load %arg0[%c1, %c0_26, %c0_27] : memref<2x4x72xf32, #tpu.memory_space<vmem>>, vector<1x4x72xf32>
    %89 = vector.shape_cast %88 : vector<1x4x72xf32> to vector<4x72xf32>
    %c1_28 = arith.constant 1 : index
    %c0_29 = arith.constant 0 : index
    %c0_30 = arith.constant 0 : index
    %90 = vector.load %arg1[%c1_28, %c0_29, %c0_30] : memref<2x8x4xf32, #tpu.memory_space<vmem>>, vector<1x8x4xf32>
    %91 = vector.shape_cast %90 : vector<1x8x4xf32> to vector<8x4xf32>
    %92 = vector.extract_strided_slice %89 {offsets = [0, 0], sizes = [1, 72], strides = [1, 1]} : vector<4x72xf32> to vector<1x72xf32>
    %93 = vector.extract_strided_slice %89 {offsets = [1, 0], sizes = [1, 72], strides = [1, 1]} : vector<4x72xf32> to vector<1x72xf32>
    %94 = vector.extract_strided_slice %89 {offsets = [2, 0], sizes = [1, 72], strides = [1, 1]} : vector<4x72xf32> to vector<1x72xf32>
    %95 = vector.extract_strided_slice %89 {offsets = [3, 0], sizes = [1, 72], strides = [1, 1]} : vector<4x72xf32> to vector<1x72xf32>
    %96 = vector.extract_strided_slice %91 {offsets = [0, 0], sizes = [8, 1], strides = [1, 1]} : vector<8x4xf32> to vector<8x1xf32>
    %97 = vector.extract_strided_slice %91 {offsets = [0, 1], sizes = [8, 1], strides = [1, 1]} : vector<8x4xf32> to vector<8x1xf32>
    %98 = vector.extract_strided_slice %91 {offsets = [0, 2], sizes = [8, 1], strides = [1, 1]} : vector<8x4xf32> to vector<8x1xf32>
    %99 = vector.extract_strided_slice %91 {offsets = [0, 3], sizes = [8, 1], strides = [1, 1]} : vector<8x4xf32> to vector<8x1xf32>
    %100 = arith.subf %94, %92 : vector<1x72xf32>
    %cst_31 = arith.constant 1.000000e+00 : f32
    %101 = vector.broadcast %cst_31 : f32 to vector<1x72xf32>
    %102 = arith.addf %100, %101 : vector<1x72xf32>
    %103 = arith.subf %95, %93 : vector<1x72xf32>
    %cst_32 = arith.constant 1.000000e+00 : f32
    %104 = vector.broadcast %cst_32 : f32 to vector<1x72xf32>
    %105 = arith.addf %103, %104 : vector<1x72xf32>
    %106 = arith.subf %98, %96 : vector<8x1xf32>
    %cst_33 = arith.constant 1.000000e+00 : f32
    %107 = vector.broadcast %cst_33 : f32 to vector<8x1xf32>
    %108 = arith.addf %106, %107 : vector<8x1xf32>
    %109 = arith.subf %99, %97 : vector<8x1xf32>
    %cst_34 = arith.constant 1.000000e+00 : f32
    %110 = vector.broadcast %cst_34 : f32 to vector<8x1xf32>
    %111 = arith.addf %109, %110 : vector<8x1xf32>
    %112 = arith.mulf %102, %105 : vector<1x72xf32>
    %113 = arith.mulf %108, %111 : vector<8x1xf32>
    %114 = vector.broadcast %94 : vector<1x72xf32> to vector<8x72xf32>
    %115 = vector.broadcast %98 : vector<8x1xf32> to vector<8x72xf32>
    %116 = arith.minimumf %114, %115 : vector<8x72xf32>
    %117 = vector.broadcast %92 : vector<1x72xf32> to vector<8x72xf32>
    %118 = vector.broadcast %96 : vector<8x1xf32> to vector<8x72xf32>
    %119 = arith.maximumf %117, %118 : vector<8x72xf32>
    %120 = arith.subf %116, %119 : vector<8x72xf32>
    %cst_35 = arith.constant 1.000000e+00 : f32
    %121 = vector.broadcast %cst_35 : f32 to vector<8x72xf32>
    %122 = arith.addf %120, %121 : vector<8x72xf32>
    %cst_36 = arith.constant 0.000000e+00 : f32
    %123 = vector.broadcast %cst_36 : f32 to vector<8x72xf32>
    %124 = arith.maximumf %122, %123 : vector<8x72xf32>
    %125 = vector.broadcast %95 : vector<1x72xf32> to vector<8x72xf32>
    %126 = vector.broadcast %99 : vector<8x1xf32> to vector<8x72xf32>
    %127 = arith.minimumf %125, %126 : vector<8x72xf32>
    %128 = vector.broadcast %93 : vector<1x72xf32> to vector<8x72xf32>
    %129 = vector.broadcast %97 : vector<8x1xf32> to vector<8x72xf32>
    %130 = arith.maximumf %128, %129 : vector<8x72xf32>
    %131 = arith.subf %127, %130 : vector<8x72xf32>
    %cst_37 = arith.constant 1.000000e+00 : f32
    %132 = vector.broadcast %cst_37 : f32 to vector<8x72xf32>
    %133 = arith.addf %131, %132 : vector<8x72xf32>
    %cst_38 = arith.constant 0.000000e+00 : f32
    %134 = vector.broadcast %cst_38 : f32 to vector<8x72xf32>
    %135 = arith.maximumf %133, %134 : vector<8x72xf32>
    %136 = arith.mulf %124, %135 : vector<8x72xf32>
    %137 = vector.broadcast %112 : vector<1x72xf32> to vector<8x72xf32>
    %138 = vector.broadcast %113 : vector<8x1xf32> to vector<8x72xf32>
    %139 = arith.addf %137, %138 : vector<8x72xf32>
    %140 = arith.subf %139, %136 : vector<8x72xf32>
    %141 = tpu.reciprocal %140 {approx = true} : vector<8x72xf32> -> vector<8x72xf32>
    %142 = arith.mulf %136, %141 : vector<8x72xf32>
    %cst_39 = arith.constant 1.000000e+00 : f32
    %143 = vector.broadcast %cst_39 : f32 to vector<8x1xf32>
    %144 = arith.cmpf oeq, %108, %143 : vector<8x1xf32>
    %cst_40 = arith.constant 1.000000e+00 : f32
    %145 = vector.broadcast %cst_40 : f32 to vector<8x1xf32>
    %146 = arith.cmpf oeq, %111, %145 : vector<8x1xf32>
    %147 = arith.andi %144, %146 : vector<8x1xi1>
    %cst_41 = arith.constant 1.000000e+00 : f32
    %148 = vector.broadcast %cst_41 : f32 to vector<1x72xf32>
    %149 = arith.cmpf oeq, %102, %148 : vector<1x72xf32>
    %cst_42 = arith.constant 1.000000e+00 : f32
    %150 = vector.broadcast %cst_42 : f32 to vector<1x72xf32>
    %151 = arith.cmpf oeq, %105, %150 : vector<1x72xf32>
    %152 = arith.andi %149, %151 : vector<1x72xi1>
    %cst_43 = arith.constant 0.000000e+00 : f32
    %153 = vector.shape_cast %147 : vector<8x1xi1> to vector<8x1xi1>
    %154 = vector.broadcast %153 : vector<8x1xi1> to vector<8x72xi1>
    %155 = vector.broadcast %cst_43 : f32 to vector<8x72xf32>
    %156 = arith.select %154, %155, %142 : vector<8x72xi1>, vector<8x72xf32>
    %cst_44 = arith.constant -1.000000e+00 : f32
    %157 = vector.shape_cast %152 : vector<1x72xi1> to vector<1x72xi1>
    %158 = vector.broadcast %157 : vector<1x72xi1> to vector<8x72xi1>
    %159 = vector.broadcast %cst_44 : f32 to vector<8x72xf32>
    %160 = arith.select %158, %159, %156 : vector<8x72xi1>, vector<8x72xf32>
    %cst_45 = arith.constant dense<0xFF800000> : vector<72xf32>
    %161 = vector.multi_reduction <maximumf>, %160, %cst_45 [0] : vector<8x72xf32> to vector<72xf32>
    %162 = vector.shape_cast %161 : vector<72xf32> to vector<1x72xf32>
    %163 = tpu.iota {dimensions = array<i32: 0>} : vector<8x72xi32>
    %164 = vector.broadcast %162 : vector<1x72xf32> to vector<8x72xf32>
    %165 = arith.cmpf oeq, %160, %164 : vector<8x72xf32>
    %c8_i32_46 = arith.constant 8 : i32
    %166 = vector.broadcast %c8_i32_46 : i32 to vector<8x72xi32>
    %167 = arith.select %165, %163, %166 : vector<8x72xi1>, vector<8x72xi32>
    %cst_47 = arith.constant dense<2147483647> : vector<72xi32>
    %168 = vector.multi_reduction <minsi>, %167, %cst_47 [0] : vector<8x72xi32> to vector<72xi32>
    %169 = vector.shape_cast %168 : vector<72xi32> to vector<1x72xi32>
    %c1_48 = arith.constant 1 : index
    %c0_49 = arith.constant 0 : index
    %c0_50 = arith.constant 0 : index
    %170 = vector.load %arg2[%c1_48, %c0_49, %c0_50] : memref<2x1x72xf32, #tpu.memory_space<vmem>>, vector<1x1x72xf32>
    %171 = vector.shape_cast %170 : vector<1x1x72xf32> to vector<1x72xf32>
    %172 = vector.shape_cast %162 : vector<1x72xf32> to vector<1x1x72xf32>
    tpu.vector_store %arg2[%c1_48, %c0_49, %c0_50], %172 {strides = array<i32>} : memref<2x1x72xf32, #tpu.memory_space<vmem>>, vector<1x1x72xf32>,
    %c1_51 = arith.constant 1 : index
    %c0_52 = arith.constant 0 : index
    %c0_53 = arith.constant 0 : index
    %173 = vector.load %arg3[%c1_51, %c0_52, %c0_53] : memref<2x1x72xi32, #tpu.memory_space<vmem>>, vector<1x1x72xi32>
    %174 = vector.shape_cast %173 : vector<1x1x72xi32> to vector<1x72xi32>
    %175 = vector.shape_cast %169 : vector<1x72xi32> to vector<1x1x72xi32>
    tpu.vector_store %arg3[%c1_51, %c0_52, %c0_53], %175 {strides = array<i32>} : memref<2x1x72xi32, #tpu.memory_space<vmem>>, vector<1x1x72xi32>,
    return
  }
}

</mosaic_0001>

<bundles_post_ra>
// kernel: tpu_custom_call.1
= control target key start
LH: loop header
LB: loop body
LE: loop exit
PB: predicated region body
PF: predicated region fallthrough
CT: control target
= control target key end

     0   :  { %9 = vsyncpa [#allocation3], 0  ;;  %s371_s14 = smov 2   ;;  %v372_v1 = vmov 0   ;;  %s467_s0 = inlined_call_operand.vmem [shape: f32[2,4,72], index: 0, kind: input, shape index: {}]   ;;  %s468_s1 = inlined_call_operand.vmem [shape: f32[2,8,4], index: 1, kind: input, shape index: {}]   ;;  %s469_s2 = inlined_call_operand.hbm [shape: f32[2,1,72], index: 2, kind: output, shape index: {0}]   ;;  %s470_s3 = inlined_call_operand.hbm [shape: s32[2,1,72], index: 3, kind: output, shape index: {1}]  }
   0x1   :  { %v16_v0 = vld [vmem:[%s468_s1] sm:$0xff]  ;;  %314 = vset.pattern.permute.xlu1 %v372_v1 }
   0x2   :  { %23 = vrot.lane.b32.xlu0 %v16_v0, %s371_s14 }
   0x3   :  { %10 = vsyncpa [#allocation5], 0  ;;  %v302_v2 = vld [vmem:[%s468_s1 + $0x8] sm:$0xff]  ;;  %v373_v3 = vmov 2   ;;  %s374_s17 = smov 127   ;;  %v375_v12 = vmov 1   ;;  %v37_v23 = vlaneseq }
   0x4   :  { %313 = vset.pattern.permute.xlu0 %v373_v3  ;;  %v376_v13 = vmov 3   ;;  %v15_v27 = vld [vmem:[%s467_s0] sm:$0xf]  ;;  %v301_v34 = vld [vmem:[%s467_s0 + $0x4] sm:$0xf]  ;;  %vm117_vm13 = vcmask 588800  }
   0x5   :  { %v417_v25 = vshrl.u32 %v37_v23, 7  ;;  %v18_v31 = vrot.slane %v15_v27, 6  ;;  %v147_v39 = vrot.slane %v301_v34, 6  ;;  %s377_s0 = smov [#allocation2]  }
   0x6   :  { %152 = vrot.lane.b32.xlu0 %v302_v2, %s371_s14  ;;  %s274_s21 = sshll.u32 %s377_s0, 4  ;;  %s275_s21 = int_to_ptr.vmem [resolvable:$true] %s274_s21 }
   0x7   :  { %v48_v29 = vsub.s32 0, %v417_v25  ;;  %v424_v30 = vsub.s32 2, %v417_v25  ;;  %v60_v32 = vsub.s32 3, %v417_v25  ;;  %v69_v33 = vsub.s32 1, %v417_v25  ;;  %s327_s22 = scalar_lea.vmem %s275_s21, 32  ;;  %p332_p1 = scmp.lt.s32.totalorder %s275_s21, %s275_s21 }
   0x8   :  { %v20_v38 = vsub.f32 %v15_v27, %v18_v31  ;;  %v149_v48 = vsub.f32 %v301_v34, %v147_v39  ;;  %p328_p0 = scmp.ne.s32.totalorder %s275_s21, %s327_s22  ;;  %p333_p2 = scmp.lt.s32.totalorder %s327_s22, %s327_s22 }
   0x9   :  { %v49_v35 = vrot.slane %v15_v27, %v48_v29  ;;  %v40_v36 = vrot.slane %v15_v27, %v424_v30  ;;  %v61_v40 = vrot.slane %v15_v27, %v60_v32  ;;  %v70_v42 = vrot.slane %v15_v27, %v69_v33 }
   0xa   :  { %v169_v43 = vrot.slane %v301_v34, %v424_v30  ;;  %v190_v44 = vrot.slane %v301_v34, %v60_v32  ;;  %v21_v47 = vadd.f32 1.0, %v20_v38  ;;  %v178_v51 = vrot.slane %v301_v34, %v48_v29  ;;  %p334_p3 = por %p333_p2, %p332_p1 }
   0xb   :  { %v199_v52 = vrot.slane %v301_v34, %v69_v33  ;;  %v150_v58 = vadd.f32 1.0, %v149_v48 }
   0xc   :  { %v29_v57 = vrot.slane %v21_v47, 1  ;;  %vm99_vm6 = vcmp.eq.f32.partialorder %v21_v47, 1.0  ;;  %p335_p4 = pnand %p334_p3, %p328_p0 }
   0xd   :  { %vm228_vm7 = vcmp.eq.f32.partialorder %v150_v58, 1.0 }
   0xe   :  { %v31_v63 = vmul.f32 %v29_v57, %v21_v47 }
  0x74   :  { %v24_v4 = vpop.permute.xlu0 %23 }
  0x75   :  { %v26_v5 = vsub.f32 %v16_v0, %v24_v4 }
  0x77   :  { %v27_v6 = vadd.f32 1.0, %v26_v5 }
  0x78   :  { %v153_v7 = vpop.permute.xlu0 %152 }
  0x79   :  { %v155_v8 = vsub.f32 %v302_v2, %v153_v7  ;;  %33 = vrot.lane.b32.xlu1 %v27_v6, %s374_s17  ;;  %vm93_vm0 = vcmp.eq.f32.partialorder %v27_v6, 1.0 }
  0x7a   :  { %v94_v9 = vsel %vm93_vm0, 1, %v372_v1 }
  0x7b   :  { %v156_v10 = vadd.f32 1.0, %v155_v8  ;;  %95 = vrot.lane.b32.xlu0 %v94_v9, %s374_s17 }
  0x7d   :  { %162 = vrot.lane.b32.xlu1 %v156_v10, %s374_s17  ;;  %vm222_vm1 = vcmp.eq.f32.partialorder %v156_v10, 1.0 }
  0x7e   :  { %v223_v11 = vsel %vm222_vm1, 1, %v372_v1 }
  0x7f   :  { %42 = vperm.xlu0 %313, %v16_v0  }
  0x81   :  { %224 = vrot.lane.b32.xlu1 %v223_v11, %s374_s17 }
  0x83   :  { %316 = vset.pattern.permute.xlu0 %v375_v12 }
  0x84   :  { %72 = vperm.xlu0 %316, %v16_v0  }
  0x85   :  { %51 = vperm.xlu1 %314, %v16_v0  }
  0x88   :  { %319 = vset.pattern.permute.xlu0 %v376_v13 }
  0x89   :  { %315 = vset.pattern.permute.xlu1 %v376_v13  ;;  %192 = vperm.xlu0 %319, %v302_v2  }
  0x8a   :  { %63 = vperm.xlu1 %315, %v16_v0   ;;  %v158_v0 = vrot.slane %v150_v58, 1 }
  0x8c   :  { %v160_v7 = vmul.f32 %v158_v0, %v150_v58 }
  0x8d   :  { %322 = vset.pattern.permute.xlu0 %v373_v3 }
  0x8e   :  { %317 = vset.pattern.permute.xlu1 %v373_v3 }
  0x8f   :  { %171 = vperm.xlu1 %317, %v302_v2  }
  0x93   :  { %318 = vset.pattern.permute.xlu1 %v372_v1 }
  0x94   :  { %180 = vperm.xlu1 %318, %v302_v2  }
  0x98   :  { %320 = vset.pattern.permute.xlu1 %v375_v12  ;;  %v100_v12 = vsel %vm99_vm6, 1, %v372_v1 }
  0x99   :  { %201 = vperm.xlu1 %320, %v302_v2  }
  0x9d   :  { %321 = vset.pattern.permute.xlu1 %v373_v3 }
  0xeb   :  { %v34_v14 = vpop.permute.xlu1 %33 }
  0xec   :  { %v36_v15 = vmul.f32 %v34_v14, %v27_v6  ;;  %v83_v6 = vrot.slane %v31_v63, %v424_v30  ;;  %v212_v14 = vrot.slane %v160_v7, %v424_v30 }
  0xed   :  { %v96_v16 = vpop.permute.xlu0 %95 }
  0xee   :  { %vm97_vm2 = vcmp.ne.s32.totalorder %v96_v16, 0  ;;  %86 = vperm.xlu1 %321, %v36_v15  }
  0xef   :  { %vm98_vm3 = vmand %vm93_vm0, %vm97_vm2  ;;  %v163_v17 = vpop.permute.xlu1 %162 }
  0xf0   :  { %v165_v18 = vmul.f32 %v163_v17, %v156_v10  ;;  %v104_v19 = vsel %vm98_vm3, 1, %v372_v1 }
  0xf2   :  { %215 = vperm.xlu0 %322, %v165_v18   ;;  %106 = vperm.xlu1 %321, %v104_v19   ;;  %v101_v19 = vrot.slane %v100_v12, 1 }
  0xf3   :  { %v225_v20 = vpop.permute.xlu1 %224 }
  0xf4   :  { %vm226_vm4 = vcmp.ne.s32.totalorder %v225_v20, 0  ;;  %vm102_vm8 = vcmp.ne.s32.totalorder %v101_v19, 0 }
  0xf5   :  { %vm227_vm5 = vmand %vm222_vm1, %vm226_vm4  ;;  %vm139_vm1 = vcmask 581632  }
  0xf6   :  { %v233_v21 = vsel %vm227_vm5, 1, %v372_v1  ;;  %vm103_vm9 = vmand %vm99_vm6, %vm102_vm8 }
  0xf7   :  { %235 = vperm.xlu1 %321, %v233_v21   ;;  %v229_v21 = vsel %vm228_vm7, 1, %v372_v1 }
  0xfa   :  { %v43_v28 = vpop.permute.xlu0 %42 }
  0xfb   :  { %v45_v46 = vmin.f32 %v40_v36, %v43_v28  ;;  %v110_v28 = vsel %vm103_vm9, 1, %v372_v1 }
  0xfc   :  { %v114_v31 = vrot.slane %v110_v28, %v424_v30 }
  0xfe   :  { %vm115_vm12 = vcmp.eq.s32.totalorder %v114_v31, 1 }
  0xff   :  { %v73_v41 = vpop.permute.xlu0 %72 }
 0x100   :  { %v52_v22 = vpop.permute.xlu1 %51  ;;  %v75_v50 = vmax.f32 %v70_v42, %v73_v41 }
 0x101   :  { %v54_v45 = vmax.f32 %v49_v35, %v52_v22 }
 0x103   :  { %v55_v55 = vsub.f32 %v45_v46, %v54_v45 }
 0x104   :  { %v193_v53 = vpop.permute.xlu0 %192 }
 0x105   :  { %v64_v24 = vpop.permute.xlu1 %63  ;;  %v195_v56 = vmin.f32 %v190_v44, %v193_v53  ;;  %v56_v2 = vadd.f32 1.0, %v55_v55 }
 0x106   :  { %v66_v49 = vmin.f32 %v61_v40, %v64_v24 }
 0x107   :  { %v57_v8 = vmax.f32 %v56_v2, 0.0 }
 0x108   :  { %v76_v59 = vsub.f32 %v66_v49, %v75_v50 }
 0x10a   :  { %v172_v26 = vpop.permute.xlu1 %171  ;;  %v77_v3 = vadd.f32 1.0, %v76_v59 }
 0x10b   :  { %v174_v60 = vmin.f32 %v169_v43, %v172_v26  ;;  %v230_v26 = vrot.slane %v229_v21, 1 }
 0x10c   :  { %v78_v9 = vmax.f32 %v77_v3, 0.0 }
 0x10d   :  { %vm231_vm10 = vcmp.ne.s32.totalorder %v230_v26, 0 }
 0x10e   :  { %v79_v17 = vmul.f32 %v78_v9, %v57_v8  ;;  %vm232_vm11 = vmand %vm228_vm7, %vm231_vm10 }
 0x10f   :  { %v181_v37 = vpop.permute.xlu1 %180  ;;  %v239_v32 = vsel %vm232_vm11, 1, %v372_v1 }
 0x110   :  { %v183_v61 = vmax.f32 %v178_v51, %v181_v37  ;;  %v243_v35 = vrot.slane %v239_v32, %v424_v30 }
 0x112   :  { %v184_v4 = vsub.f32 %v174_v60, %v183_v61  ;;  %vm244_vm15 = vcmp.eq.s32.totalorder %v243_v35, 1 }
 0x114   :  { %v202_v54 = vpop.permute.xlu1 %201  ;;  %v185_v10 = vadd.f32 1.0, %v184_v4 }
 0x115   :  { %v204_v62 = vmax.f32 %v199_v52, %v202_v54 }
 0x116   :  { %v186_v15 = vmax.f32 %v185_v10, 0.0 }
 0x117   :  { %v205_v5 = vsub.f32 %v195_v56, %v204_v62 }
 0x119   :  { %v206_v11 = vadd.f32 1.0, %v205_v5 }
 0x11b   :  { %v207_v16 = vmax.f32 %v206_v11, 0.0 }
 0x11d   :  { %v208_v23 = vmul.f32 %v207_v16, %v186_v15 }
 0x169   :  { %v87_v13 = vpop.permute.xlu1 %86 }
 0x16a   :  { %v89_v18 = vadd.f32 %v87_v13, %v83_v6 }
 0x16c   :  { %v90_v20 = vsub.f32 %v89_v18, %v79_v17 }
 0x16d   :  { %v216_v22 = vpop.permute.xlu0 %215  ;;  %v107_v29 = vpop.permute.xlu1 %106 }
 0x16e   :  { %323 = vrcp.f32 %v90_v20  ;;  %v218_v24 = vadd.f32 %v216_v22, %v212_v14  ;;  %vm108_vm14 = vcmp.eq.s32.totalorder %v107_v29, 1 }
 0x170   :  { %v219_v27 = vsub.f32 %v218_v24, %v208_v23 }
 0x172   :  { %325 = vrcp.f32 %v219_v27  ;;  %v236_v37 = vpop.permute.xlu1 %235 }
 0x173   :  { %vm237_vm0 = vcmp.eq.s32.totalorder %v236_v37, 1 }
 0x17b   :  { %v324_v33 = vpop.eup %323 }
 0x17c   :  { %v92_v34 = vmul.f32 %v324_v33, %v79_v17 }
 0x17e   :  { %v109_v36 = vsel %vm108_vm14, 0.0, %v92_v34 }
 0x17f   :  { %v326_v38 = vpop.eup %325  ;;  %v116_v39 = vsel %vm115_vm12, -1.0, %v109_v36 }
 0x180   :  { %v118_v40 = vsel %vm117_vm13, %v116_v39, -inf  ;;  %v221_v41 = vmul.f32 %v326_v38, %v208_v23 }
 0x181   :  { %v119_v42 = vrot.slane %v118_v40, 4 }
 0x182   :  { %v238_v43 = vsel %vm237_vm0, 0.0, %v221_v41 }
 0x183   :  { %v120_v44 = vmax.f32 %v118_v40, %v119_v42  ;;  %v245_v1 = vsel %vm244_vm15, -1.0, %v238_v43 }
 0x184   :  { %v246_v45 = vsel %vm117_vm13, %v245_v1, -inf }
 0x185   :  { %v121_v46 = vrot.slane %v120_v44, 2  ;;  %v247_v47 = vrot.slane %v246_v45, 4 }
 0x187   :  { %v122_v30 = vmax.f32 %v120_v44, %v121_v46  ;;  %v248_v48 = vmax.f32 %v246_v45, %v247_v47 }
 0x189   :  { %v123_v49 = vrot.slane %v122_v30, 1  ;;  %v249_v50 = vrot.slane %v248_v48, 2 }
 0x18b   :  { %v124_v51 = vmax.f32 %v122_v30, %v123_v49  ;;  %v250_v52 = vmax.f32 %v248_v48, %v249_v50 }
 0x18d   :  { %vm127_vm2 = vcmp.eq.f32.partialorder %v116_v39, %v124_v51  ;;  %v251_v53 = vrot.slane %v250_v52, 1  ;;  %140 = vst.msk [vmem:[#allocation2] sm:$0x1] %vm139_vm1, %v124_v51 }
 0x18e   :  { %v128_v54 = vsel %vm127_vm2, %v417_v25, 8 }
 0x18f   :  { %v129_v55 = vsel %vm117_vm13, %v128_v54, 2147483647  ;;  %v252_v56 = vmax.f32 %v250_v52, %v251_v53 }
 0x190   :  { %v130_v57 = vrot.slane %v129_v55, 4 }
 0x191   :  { %vm253_vm3 = vcmp.eq.f32.partialorder %v245_v1, %v252_v56  ;;  %266 = vst.msk [vmem:[#allocation2 + $0x1] sm:$0x1] %vm139_vm1, %v252_v56 }
 0x192   :  { %vm131_vm4 = vcmp.lt.s32.totalorder %v129_v55, %v130_v57  ;;  %v254_v58 = vsel %vm253_vm3, %v417_v25, 8 }
 0x193   :  { %338 = shalt.err (!%p335_p4)
}
 0x194   :  { %s378_s23 = smov 16   ;;  %s379_s24 = smov 1   ;;  %v132_v59 = vsel %vm131_vm4, %v129_v55, %v130_v57  ;;  %v255_v60 = vsel %vm117_vm13, %v254_v58, 2147483647 }
 0x195   :  { %280 = dma.vmem_to_hbm [thread:$0]  %s275_s21, 32, %s469_s2, [#allocation3], %s378_s23, %s378_s23, %s379_s24   ;;  %v133_v25 = vrot.slane %v132_v59, 2  ;;  %v256_v61 = vrot.slane %v255_v60, 4 }
 0x196   :  { %s380_s27 = smov [#allocation4]  }
 0x197   :  { %vm134_vm5 = vcmp.lt.s32.totalorder %v132_v59, %v133_v25  ;;  %vm257_vm6 = vcmp.lt.s32.totalorder %v255_v60, %v256_v61  ;;  %s286_s28 = sshll.u32 %s380_s27, 4  ;;  %s287_s28 = int_to_ptr.vmem [resolvable:$true] %s286_s28 }
 0x198   :  { %v135_v62 = vsel %vm134_vm5, %v132_v59, %v133_v25  ;;  %v258_v63 = vsel %vm257_vm6, %v255_v60, %v256_v61  ;;  %s347_s2 = scalar_lea.vmem %s287_s28, 32  ;;  %p352_p6 = scmp.lt.s32.totalorder %s287_s28, %s287_s28 }
 0x199   :  { %v136_v0 = vrot.slane %v135_v62, 1  ;;  %v259_v2 = vrot.slane %v258_v63, 2  ;;  %p348_p5 = scmp.ne.s32.totalorder %s287_s28, %s347_s2  ;;  %p353_p7 = scmp.lt.s32.totalorder %s347_s2, %s347_s2 }
 0x19b   :  { %vm260_vm7 = vcmp.lt.s32.totalorder %v258_v63, %v259_v2  ;;  %vm137_vm8 = vcmp.lt.s32.totalorder %v135_v62, %v136_v0  ;;  %p354_p8 = por %p353_p7, %p352_p6 }
 0x19c   :  { %v261_v3 = vsel %vm260_vm7, %v258_v63, %v259_v2  ;;  %v138_v4 = vsel %vm137_vm8, %v135_v62, %v136_v0 }
 0x19d   :  { %v262_v5 = vrot.slane %v261_v3, 1  ;;  %141 = vst.msk [vmem:[#allocation4] sm:$0x1] %vm139_vm1, %v138_v4  ;;  %p355_p9 = pnand %p354_p8, %p348_p5 }
 0x19f   :  { %vm263_vm9 = vcmp.lt.s32.totalorder %v261_v3, %v262_v5 }
 0x1a0   :  { %v264_v6 = vsel %vm263_vm9, %v261_v3, %v262_v5 }
 0x1a1   :  { %268 = vst.msk [vmem:[#allocation4 + $0x1] sm:$0x1] %vm139_vm1, %v264_v6 }
 0x1a2   :  { %358 = shalt.err (!%p355_p9)
}
 0x1a3   :  { %292 = dma.vmem_to_hbm [thread:$0]  %s287_s28, 32, %s470_s3, [#allocation5], %s378_s23, %s378_s23, %s379_s24  }
 0x1a4   :  { %367 = dma.done.wait [#allocation3], 32  }
 0x1a5   :  { %368 = vsyncadd [#allocation3], 4294967264 }
 0x1a6   :  { %369 = dma.done.wait [#allocation5], 32  }
 0x1a7   :  { %370 = vsyncadd [#allocation5], 4294967264 }
 0x1a8   :  { %299 = vsyncpa [#allocation3], 1 }
 0x1a9   :  { %300 = vsyncpa [#allocation5], 1 }

</bundles_post_ra>
